<compile_context>
chip_gen: v7x
topology: tpu7x:2x2x1
jax: 0.10.0
libtpu: 0.0.40
codegen_flags: <defaults>
</compile_context>

<pallas_src>
import jax
import jax.numpy as jnp
from jax import lax
from jax.experimental import pallas as pl
from jax.experimental.pallas import tpu as pltpu


def _make_attn_kernel(n_valid, n_padded):
    """Build the attention kernel; n_valid/n_padded are static Python ints."""
    needs_mask = n_valid != n_padded

    def kernel(q_ref, k_ref, v_ref, out_ref, attn_ref):
        # q_ref    : (1, C8p, TQ)  bf16   query tile (channel-major)
        # k_ref    : (1, C8p, Np)  bf16   full K for this batch element (resident across t)
        # v_ref    : (1, C,   Np)  bf16   full V for this batch element (resident across t)
        # out_ref  : (1, C,   TQ)  f32    channel-major output tile (lane-dense)
        # attn_ref : (1, TQ,  Np)  f32    attention rows of this query tile (lane-dense)
        q = q_ref[0]                                                    # (C8p, TQ)
        k = k_ref[0]                                                    # (C8p, Np)

        # energy[m, n] = sum_f q[f, m] * k[f, n]   (zero-padded rows contribute 0)
        s = lax.dot_general(q, k, (((0,), (0,)), ((), ())),
                            preferred_element_type=jnp.float32)         # (TQ, Np)

        if needs_mask:
            # Padded key columns must get zero attention weight.
            col = lax.broadcasted_iota(jnp.int32, s.shape, 1)
            s = jnp.where(col < n_valid, s, -1e30)

        # Row-wise numerically-stable softmax; reciprocal goes to the EUP slot.
        s = jnp.exp(s - jnp.max(s, axis=-1, keepdims=True))
        s = s * pl.reciprocal(jnp.sum(s, axis=-1, keepdims=True), approx=True)
        attn_ref[0] = s.astype(attn_ref.dtype)

        # out[c, m] = sum_n v[c, n] * attn[m, n]  -- keeps out channel-major with a
        # lane-dense TQ store.  (Review note: if a vxpose shows up in the Mosaic
        # dump for this transposed-RHS contraction, restructure the operand.)
        out = lax.dot_general(v_ref[0], s.astype(jnp.bfloat16),
                              (((1,), (1,)), ((), ())),
                              preferred_element_type=jnp.float32)        # (C, TQ)
        out_ref[0] = out.astype(out_ref.dtype)

    return kernel


def _vmem_capacity_bytes():
    try:
        return int(pltpu.get_tpu_info().vmem_capacity_bytes)
    except Exception:
        return 64 * 1024 * 1024      # conservative fallback: v7x per-core VMEM


def _choose_tile_and_vmem_limit(n_padded, c, c8p):
    """Generation-aware query-tile size and VMEM limit (v5e/v6e: 128 MiB, v7x: 64 MiB)."""
    budget = min(int(_vmem_capacity_bytes() * 0.75), 100 * 1024 * 1024)

    def per_step_bytes(tq):
        attn_out = 2 * tq * n_padded * 4                 # double-buffered f32 attn tile
        out_blk = 2 * c * tq * 4                         # double-buffered f32 out tile
        kv_in = 2 * (c8p + c) * n_padded * 2             # double-buffered bf16 K and V
        q_in = 2 * c8p * tq * 2                          # double-buffered bf16 Q tile
        temps = 3 * tq * n_padded * 4 + tq * n_padded * 2  # live softmax temporaries
        return attn_out + out_blk + kv_in + q_in + temps

    tile = 128                                            # n_padded is always a multiple of 128
    for cand in (1024, 512, 256, 128):
        if n_padded % cand == 0 and per_step_bytes(cand) <= budget:
            tile = cand
            break
    vmem_limit = max(budget, 32 * 1024 * 1024)
    return tile, vmem_limit


def self_attn_forward(x_nchw, wq, wk, wv, bq, bk, bv, *, tq=None,
                      attn_dtype=jnp.float32):
    """SAGAN Self_Attn forward.

    Args:
      x_nchw: (B, C, W, H) float32.
      wq, wk: (C//8, C) 1x1-conv weights in torch (out_channels, in_channels) layout.
      wv:     (C, C);  bq, bk: (C//8,);  bv: (C,).
      tq:     optional static query-tile override (multiple of 128 dividing padded N).
      attn_dtype: dtype of the returned attention map (bf16 halves the dominant
                  N^2 HBM writeback if the consumer tolerates it; default f32
                  matches the PyTorch reference).
    Returns: (out (B, C, W, H) f32, attention (B, N, N) attn_dtype), N = W*H.
    """
    B, C, W, H = x_nchw.shape
    N = W * H
    C8 = wq.shape[0]
    C8p = -(-C8 // 8) * 8            # pad q/k channels to an 8-sublane boundary
    Np = -(-N // 128) * 128          # pad N to a lane-dense multiple of 128

    if tq is None:
        TQ, vmem_limit = _choose_tile_and_vmem_limit(Np, C, C8p)
    else:
        assert tq % 128 == 0 and Np % tq == 0, "tq must be a multiple of 128 dividing padded N"
        TQ = tq
        _, vmem_limit = _choose_tile_and_vmem_limit(Np, C, C8p)

    x_bcn = x_nchw.reshape(B, C, N)                       # free reshape, no transpose

    # 1x1-conv projections as plain GEMMs (hoisted out of the kernel per review).
    q = jnp.einsum("oc,bcn->bon", wq, x_bcn) + bq[None, :, None]   # (B, C8, N)
    k = jnp.einsum("oc,bcn->bon", wk, x_bcn) + bk[None, :, None]   # (B, C8, N)
    v = jnp.einsum("oc,bcn->bon", wv, x_bcn) + bv[None, :, None]   # (B, C,  N)

    # Zero-pad to sublane/lane boundaries and cast to bf16 (MXU operands; halves
    # the kernel-input HBM DMA and the resident double-buffered blocks).
    q_p = jnp.pad(q, ((0, 0), (0, C8p - C8), (0, Np - N))).astype(jnp.bfloat16)
    k_p = jnp.pad(k, ((0, 0), (0, C8p - C8), (0, Np - N))).astype(jnp.bfloat16)
    v_p = jnp.pad(v, ((0, 0), (0, 0), (0, Np - N))).astype(jnp.bfloat16)

    out_p, attn_p = pl.pallas_call(
        _make_attn_kernel(N, Np),
        out_shape=(jax.ShapeDtypeStruct((B, C, Np), jnp.float32),
                   jax.ShapeDtypeStruct((B, Np, Np), attn_dtype)),
        grid=(B, Np // TQ),
        in_specs=[
            pl.BlockSpec((1, C8p, TQ), lambda b, t: (b, 0, t)),   # Q tile
            pl.BlockSpec((1, C8p, Np), lambda b, t: (b, 0, 0)),   # full K (re-used across t)
            pl.BlockSpec((1, C, Np), lambda b, t: (b, 0, 0)),     # full V (re-used across t)
        ],
        out_specs=(
            pl.BlockSpec((1, C, TQ), lambda b, t: (b, 0, t)),     # out, channel-major
            pl.BlockSpec((1, TQ, Np), lambda b, t: (b, t, 0)),    # attention rows
        ),
        compiler_params=pltpu.CompilerParams(
            # No cross-step dependencies remain, so both axes are "parallel":
            # megacore shards the batch axis, or the tile axis when B == 1.
            dimension_semantics=("parallel", "parallel"),
            vmem_limit_bytes=vmem_limit),
    )(q_p, k_p, v_p)

    out = out_p[:, :, :N].reshape(B, C, W, H)             # drop N padding, free reshape
    attn = attn_p[:, :N, :N]
    return out, attn


def _reference(x_nchw, wq, wk, wv, bq, bk, bv):
    """Pure-JAX f32 reference mirroring the PyTorch forward exactly."""
    B, C, W, H = x_nchw.shape
    N = W * H
    x_bcn = x_nchw.reshape(B, C, N)
    q = jnp.einsum("oc,bcn->bon", wq, x_bcn) + bq[None, :, None]      # (B, C8, N)
    k = jnp.einsum("oc,bcn->bon", wk, x_bcn) + bk[None, :, None]      # (B, C8, N)
    v = jnp.einsum("oc,bcn->bon", wv, x_bcn) + bv[None, :, None]      # (B, C,  N)
    energy = jnp.einsum("bom,bon->bmn", q, k)                         # (B, N, N)
    attention = jax.nn.softmax(energy, axis=-1)
    out = jnp.einsum("bcn,bmn->bcm", v, attention)                    # (B, C, N)
    return out.reshape(B, C, W, H), attention


if __name__ == "__main__":
    fwd = jax.jit(self_attn_forward, static_argnames=("tq", "attn_dtype"))

    def run_case(name, B, C, W, H, tq=None):
        # in_dim must be a multiple of 8 (query/key project to in_dim // 8 channels)
        C8 = C // 8
        key = jax.random.PRNGKey(0)
        kx, kwq, kwk, kwv, kbq, kbk, kbv = jax.random.split(key, 7)

        x = jax.random.normal(kx, (B, C, W, H), dtype=jnp.float32)
        # Conv2d 1x1 weights in torch (out_channels, in_channels) layout.
        wq = jax.random.normal(kwq, (C8, C), dtype=jnp.float32) * 0.1
        wk = jax.random.normal(kwk, (C8, C), dtype=jnp.float32) * 0.1
        wv = jax.random.normal(kwv, (C, C), dtype=jnp.float32) * 0.1
        bq = jax.random.normal(kbq, (C8,), dtype=jnp.float32) * 0.05
        bk = jax.random.normal(kbk, (C8,), dtype=jnp.float32) * 0.05
        bv = jax.random.normal(kbv, (C,), dtype=jnp.float32) * 0.05
        # self.gamma is initialized to zero and unused in the reference forward.

        out, attn = fwd(x, wq, wk, wv, bq, bk, bv, tq=tq)
        out = jax.block_until_ready(out)
        attn = jax.block_until_ready(attn)

        out_ref, attn_ref = _reference(x, wq, wk, wv, bq, bk, bv)
        N = W * H
        assert out.shape == (B, C, W, H) and attn.shape == (B, N, N)
        # bf16 MXU operands + approx EUP reciprocal -> tolerances looser than pure f32.
        assert jnp.allclose(attn, attn_ref, atol=2e-2, rtol=5e-2), \
            (name, float(jnp.max(jnp.abs(attn - attn_ref))))
        assert jnp.allclose(out, out_ref, atol=5e-2, rtol=5e-2), \
            (name, float(jnp.max(jnp.abs(out - out_ref))))

    # Case 1: multi-tile grid (N=256 split into two 128-wide query tiles), B=2
    # (batch-axis megacore split).
    run_case("case1", B=2, C=32, W=16, H=16, tq=128)
    # Case 2: auto tile choice, N=49 padded to 128 (masked-column path), B=1
    # (query-tile-axis megacore split).
    run_case("case2", B=1, C=16, W=7, H=7)

    print("KERNEL_OK")
</pallas_src>

<mosaic_0001>
module attributes {stable_mosaic.version = 11 : i64} {
  func.func @kernel(%arg0: i32, %arg1: i32, %arg2: memref<1x8x128xbf16, #tpu.memory_space<vmem>>, %arg3: memref<1x8x256xbf16, #tpu.memory_space<vmem>>, %arg4: memref<1x32x256xbf16, #tpu.memory_space<vmem>>, %arg5: memref<1x32x128xf32, #tpu.memory_space<vmem>>, %arg6: memref<1x128x256xf32, #tpu.memory_space<vmem>>) attributes {dimension_semantics = [#tpu.dimension_semantics<parallel>, #tpu.dimension_semantics<parallel>], iteration_bounds = array<i64: 2, 2>, scalar_prefetch = 0 : i64, scratch_operands = 0 : i64, tpu.core_type = #tpu.core_type<tc>, window_params = [{transform_indices = @transform_0, window_bounds = array<i64: 1, 8, 128>}, {transform_indices = @transform_1, window_bounds = array<i64: 1, 8, 256>}, {transform_indices = @transform_2, window_bounds = array<i64: 1, 32, 256>}, {transform_indices = @transform_3, window_bounds = array<i64: 1, 32, 128>}, {transform_indices = @transform_4, window_bounds = array<i64: 1, 128, 256>}]} {
    %c0 = arith.constant 0 : index
    %c0_0 = arith.constant 0 : index
    %c0_1 = arith.constant 0 : index
    %0 = vector.load %arg2[%c0, %c0_0, %c0_1] : memref<1x8x128xbf16, #tpu.memory_space<vmem>>, vector<1x8x128xbf16>
    %1 = vector.shape_cast %0 : vector<1x8x128xbf16> to vector<8x128xbf16>
    %c0_2 = arith.constant 0 : index
    %c0_3 = arith.constant 0 : index
    %c0_4 = arith.constant 0 : index
    %2 = vector.load %arg3[%c0_2, %c0_3, %c0_4] : memref<1x8x256xbf16, #tpu.memory_space<vmem>>, vector<1x8x256xbf16>
    %3 = vector.shape_cast %2 : vector<1x8x256xbf16> to vector<8x256xbf16>
    %cst = arith.constant dense<0.000000e+00> : vector<128x256xf32>
    %4 = tpu.matmul %1, %3, %cst {dimension_numbers = #tpu.dot_dimension_numbers<[0], [0], [1], [1], [0, 1, 1, 1], [], []>} : vector<8x128xbf16>, vector<8x256xbf16>, vector<128x256xf32> -> vector<128x256xf32>
    %cst_5 = arith.constant dense<0xFF800000> : vector<128xf32>
    %5 = vector.multi_reduction <maximumf>, %4, %cst_5 [1] : vector<128x256xf32> to vector<128xf32>
    %6 = vector.shape_cast %5 : vector<128xf32> to vector<128x1xf32>
    %7 = vector.broadcast %6 : vector<128x1xf32> to vector<128x256xf32>
    %8 = arith.subf %4, %7 : vector<128x256xf32>
    %9 = math.exp %8 : vector<128x256xf32>
    %cst_6 = arith.constant dense<0.000000e+00> : vector<128xf32>
    %10 = vector.multi_reduction <add>, %9, %cst_6 [1] : vector<128x256xf32> to vector<128xf32>
    %11 = vector.shape_cast %10 : vector<128xf32> to vector<128x1xf32>
    %12 = tpu.reciprocal %11 {approx = true} : vector<128x1xf32> -> vector<128x1xf32>
    %13 = vector.broadcast %12 : vector<128x1xf32> to vector<128x256xf32>
    %14 = arith.mulf %9, %13 : vector<128x256xf32>
    %c0_7 = arith.constant 0 : index
    %c0_8 = arith.constant 0 : index
    %c0_9 = arith.constant 0 : index
    %15 = vector.load %arg6[%c0_7, %c0_8, %c0_9] : memref<1x128x256xf32, #tpu.memory_space<vmem>>, vector<1x128x256xf32>
    %16 = vector.shape_cast %15 : vector<1x128x256xf32> to vector<128x256xf32>
    %17 = vector.shape_cast %14 : vector<128x256xf32> to vector<1x128x256xf32>
    tpu.vector_store %arg6[%c0_7, %c0_8, %c0_9], %17 {strides = array<i32>} : memref<1x128x256xf32, #tpu.memory_space<vmem>>, vector<1x128x256xf32>,
    %c0_10 = arith.constant 0 : index
    %c0_11 = arith.constant 0 : index
    %c0_12 = arith.constant 0 : index
    %18 = vector.load %arg4[%c0_10, %c0_11, %c0_12] : memref<1x32x256xbf16, #tpu.memory_space<vmem>>, vector<1x32x256xbf16>
    %19 = vector.shape_cast %18 : vector<1x32x256xbf16> to vector<32x256xbf16>
    %20 = arith.truncf %14 : vector<128x256xf32> to vector<128x256xbf16>
    %cst_13 = arith.constant dense<0.000000e+00> : vector<32x128xf32>
    %21 = tpu.matmul %19, %20, %cst_13 {dimension_numbers = #tpu.dot_dimension_numbers<[1], [1], [0], [0], [0, 0, 1, 0], [], []>} : vector<32x256xbf16>, vector<128x256xbf16>, vector<32x128xf32> -> vector<32x128xf32>
    %c0_14 = arith.constant 0 : index
    %c0_15 = arith.constant 0 : index
    %c0_16 = arith.constant 0 : index
    %22 = vector.load %arg5[%c0_14, %c0_15, %c0_16] : memref<1x32x128xf32, #tpu.memory_space<vmem>>, vector<1x32x128xf32>
    %23 = vector.shape_cast %22 : vector<1x32x128xf32> to vector<32x128xf32>
    %24 = vector.shape_cast %21 : vector<32x128xf32> to vector<1x32x128xf32>
    tpu.vector_store %arg5[%c0_14, %c0_15, %c0_16], %24 {strides = array<i32>} : memref<1x32x128xf32, #tpu.memory_space<vmem>>, vector<1x32x128xf32>,
    return
  }
  func.func @transform_0(%arg0: i32, %arg1: i32) -> (i32, i32, i32) {
    %c0_i32 = arith.constant 0 : i32
    %c0_i32_0 = arith.constant 0 : i32
    return %arg0, %c0_i32, %arg1 : i32, i32, i32
  }
  func.func @transform_1(%arg0: i32, %arg1: i32) -> (i32, i32, i32) {
    %c0_i32 = arith.constant 0 : i32
    %c0_i32_0 = arith.constant 0 : i32
    %c0_i32_1 = arith.constant 0 : i32
    return %arg0, %c0_i32, %c0_i32_0 : i32, i32, i32
  }
  func.func @transform_2(%arg0: i32, %arg1: i32) -> (i32, i32, i32) {
    %c0_i32 = arith.constant 0 : i32
    %c0_i32_0 = arith.constant 0 : i32
    %c0_i32_1 = arith.constant 0 : i32
    return %arg0, %c0_i32, %c0_i32_0 : i32, i32, i32
  }
  func.func @transform_3(%arg0: i32, %arg1: i32) -> (i32, i32, i32) {
    %c0_i32 = arith.constant 0 : i32
    %c0_i32_0 = arith.constant 0 : i32
    return %arg0, %c0_i32, %arg1 : i32, i32, i32
  }
  func.func @transform_4(%arg0: i32, %arg1: i32) -> (i32, i32, i32) {
    %c0_i32 = arith.constant 0 : i32
    %c0_i32_0 = arith.constant 0 : i32
    return %arg0, %arg1, %c0_i32 : i32, i32, i32
  }
}

</mosaic_0001>

<bundles_post_ra>
// kernel: self_attn_forward.1
= control target key start
LH: loop header
LB: loop body
LE: loop exit
PB: predicated region body
PF: predicated region fallthrough
CT: control target
= control target key end

     0   :  { %10 = vsyncpa [#allocation4], 0  ;;  %s1840_s0 = inlined_call_operand.vmem [shape: bf16[2,8,256], index: 0, kind: input, shape index: {}]   ;;  %s1841_s1 = inlined_call_operand.vmem [shape: bf16[2,8,256], index: 1, kind: input, shape index: {}]   ;;  %s1842_s2 = inlined_call_operand.vmem [shape: bf16[2,32,256], index: 2, kind: input, shape index: {}]   ;;  %s1843_s3 = inlined_call_operand.vmem [shape: f32[2,32,256], index: 3, kind: output, shape index: {0}]   ;;  %s1844_s4 = inlined_call_operand.hbm [shape: f32[2,256,256], index: 4, kind: output, shape index: {1}]  }
   0x1   :  { %12 = vsyncpa [#allocation4 + $0x1], 0  ;;  %s1373_s15 = smov 0   ;;  %s1375_s16 = smov 0  }
   0x2   :  { %s1377_s17 = smov 0   ;;  %s1379_s18 = smov 0  }
   0x3   :  { %s1381_s19 = smov 0   ;;  %s1383_s20 = smov 0  }
   0x4   :  { %s1385_s21 = smov 0   ;;  %s1387_s22 = smov 0  }
   0x5 LB: > { %s1013_s23 = sadd.s32 4294967295, %s1342_s22   ;;  %s1014_s24 = sadd.s32 4294967294, %s1342_s22   ;;  %s1342_s22 = sphi %s1387_s22, %s18_s22   ;;  %s1338_s21 = sphi %s1385_s21, %s1854_s21   ;;  %s1334_s20 = sphi %s1383_s20, %s1853_s20   ;;  %s1330_s19 = sphi %s1381_s19, %s1852_s19   ;;  %s1326_s18 = sphi %s1379_s18, %s1851_s18   ;;  %s1322_s17 = sphi %s1377_s17, %s1850_s17   ;;  %s1318_s16 = sphi %s1375_s16, %s1849_s16   ;;  %s1314_s15 = sphi %s1373_s15, %s1848_s15  }
   0x6   : > { %s27_s25 = sadd.s32 1, %s1334_s20  ;;  %s30_s26 = sadd.s32 1, %s1338_s21 }
   0x7   : > { %p28_p0 = scmp.ge.s32.totalorder %s27_s25, 2  ;;  %p129_p1 = scmp.ne.s32.totalorder %s1322_s17, %s1318_s16 }
   0x8   : > { %p130_p2 = scmp.eq.s32.totalorder %s1013_s23, 3  ;;  %p163_p5 = scmp.ne.s32.totalorder %s1318_s16, %s1314_s15 }
   0x9   : > { %s1856_s25 = smov (%p28_p0, %s27_s25), 0  ;;  %s1858_s26 = smov (!%p28_p0, %s30_s26), %s1338_s21 }
   0xa   : > { %s115_s27 = ssub.s32 %s1334_s20, %s1856_s25  ;;  %p1424_p3 = por %p130_p2, %p129_p1 }
   0xb   : > { %p32_p4 = scmp.ge.s32.totalorder %s1858_s26, 2  ;;  %p164_p6 = scmp.eq.s32.totalorder %s1014_s24, 3 }
   0xc   : > { %p1017_p7 = scmp.ge.s32.totalorder %s1342_s22, 1  ;;  %p209_p9 = scmp.lt.s32.totalorder %s1342_s22, 5 }
   0xd   : > { %s1860_s26 = smov (%p32_p4, %s1858_s26), 0  ;;  %p1433_p8 = por %p164_p6, %p163_p5 }
   0xe   : > { %s114_s30 = ssub.s32 %s1338_s21, %s1860_s26  ;;  %s119_s5 = sadd.s32 1, %s1322_s17 }
   0xf   : > { %s116_s6 = sor.u32 %s115_s27, %s114_s30  ;;  %p210_p10 = pnand %p1017_p7, %p209_p9 }
  0x10   : > { %p117_p11 = scmp.eq.s32.totalorder %s116_s6, 0  ;;  %p252_p12 = scmp.lt.s32.totalorder (!%p210_p10), %s1330_s19, 1  ;;  %v1344_v0 = vmov (!%p210_p10), 0   ;;  %vm320_vm0 = vcmask (!%p210_p10), 1043456   ;;  %vm295_vm1 = vcmask (!%p210_p10), 64512  }
  0x11   : > { %213 = sbr.rel (%p210_p10) target bundleno = 985 (0x3d9), region = 32  ;;  %p254_p13 = scmp.lt.s32.totalorder (!%p210_p10), %s1326_s18, 1  ;;  %359 = vmatprep.mubr.bf16.mxu0 (!%p210_p10), %v1344_v0 }
  0x12   : > { %s1442_s7 = scalar_select %p117_p11, %s1322_s17, %s119_s5  }
  0x18   : > { %s1447_s8 = scalar_select %p252_p12, %s1330_s19, 1 }
  0x19   : > { %s255_s9 = scalar_select %p254_p13, %s1326_s18, 1 }
  0x1a   : > { %s1020_s10 = sshll.u32 %s1447_s8, 1  ;;  %s1051_s11 = sshll.u32 %s1447_s8, 3 }
  0x1b   : > { %s257_s12 = sadd.s32 %s1020_s10, %s255_s9  ;;  %s264_s23 = scalar_lea.vmem %s1841_s1, %s1051_s11 }
  0x1c   : > { %s1021_s24 = sshll.u32 %s257_s12, 2  ;;  %v273_v1 = vld [vmem:[%s264_s23] sm:$0xff]  ;;  %s1052_s6 = sshll.u32 %s1447_s8, 5 }
  0x1d   : > { %s259_s5 = scalar_lea.vmem %s1840_s0, %s1021_s24  ;;  %v1027_v2 = vcombine.high %v273_v1, %v273_v1  ;;  %v1026_v3 = vcombine.low %v273_v1, %v273_v1  ;;  %s1694_s11 = scalar_lea.vmem %s1842_s2, %s1052_s6 }
  0x1e   : > { %v272_v4 = vld [vmem:[%s259_s5] sm:$0xf]  ;;  %s1699_s12 = sand.u32 1, %s1318_s16   ;;  %s1043_s27 = sshll.u32 (%p1424_p3), %s1330_s19, 3 }
  0x1f   : > { %274 = vxpose.xlu0.c.b16.start.end [1/1] (short) %v272_v4, 128  ;;  %1028 = vmatprep.subr.msk.bf16.mxu0 %vm320_vm0, %v1027_v2  ;;  %v322_v5 = vsel %vm320_vm0, %v1026_v3, 0  ;;  %s1019_s8 = sshll.u32 %s1699_s12, 8  ;;  %s1018_s14 = sshll.u32 %s1699_s12, 5 }
  0x20   : > { %328 = vmatpush1.bf16.msra.mxu0 %v322_v5  ;;  %s1706_s13 = scalar_lea.vmem [#allocation3], %s1019_s8  ;;  %s244_s23 = scalar_lea.vmem [#allocation2], %s1018_s14 }
  0x21   : > { %s818_s30 = sadd.s32 (%p1424_p3), %s1326_s18, %s1043_s27 }
  0x22   : > { %s1044_s5 = sshll.u32 (%p1424_p3), %s818_s30, 3 }
  0x23   : > { %s820_s10 = scalar_lea.vmem (%p1424_p3), %s1843_s3, %s1044_s5 }
  0x85   : > { %v282_v6 = vpop.trf.xlu0 }
  0x86   : > { %1029 = vmatmul.mubr.msk.bf16.vlgmr.msra.gmra.mrb[0].mxu0 %vm295_vm1, %v282_v6 }
  0x87   : > { %369 = vmatprep.mubr.bf16.mxu0 %v1344_v0 }
  0x89   : > { %v283_v7 = vpop.trf.xlu0 }
  0x8d   : > { %v284_v8 = vpop.trf.xlu0 }
  0x8e   : > { %1030 = vmatmul.mubr.msk.bf16.gmra.mrb[4].mxu0 %vm295_vm1, %v283_v7 }
  0x8f   : > { %379 = vmatprep.mubr.bf16.mxu0 %v1344_v0 }
  0x91   : > { %v285_v9 = vpop.trf.xlu0 }
  0x95   : > { %v286_v10 = vpop.trf.xlu0 }
  0x96   : > { %1031 = vmatmul.mubr.msk.bf16.gmra.mrb[8].mxu0 %vm295_vm1, %v284_v8 }
  0x97   : > { %389 = vmatprep.mubr.bf16.mxu0 %v1344_v0 }
  0x99   : > { %v287_v11 = vpop.trf.xlu0 }
  0x9d   : > { %v288_v12 = vpop.trf.xlu0 }
  0x9e   : > { %1032 = vmatmul.mubr.msk.bf16.gmra.mrb[12].mxu0 %vm295_vm1, %v285_v9 }
  0x9f   : > { %399 = vmatprep.mubr.bf16.mxu0 %v1344_v0 }
  0xa1   : > { %v289_v13 = vpop.trf.xlu0 }
  0xa6   : > { %1033 = vmatmul.mubr.msk.bf16.gmra.mrb[16].mxu0 %vm295_vm1, %v286_v10 }
  0xa7   : > { %409 = vmatprep.mubr.bf16.mxu0 %v1344_v0 }
  0xae   : > { %1034 = vmatmul.mubr.msk.bf16.gmra.mrb[20].mxu0 %vm295_vm1, %v287_v11 }
  0xaf   : > { %419 = vmatprep.mubr.bf16.mxu0 %v1344_v0 }
  0xb6   : > { %1035 = vmatmul.mubr.msk.bf16.gmra.mrb[24].mxu0 %vm295_vm1, %v288_v12 }
  0xb7   : > { %429 = vmatprep.mubr.bf16.mxu0 %v1344_v0 }
  0xbe   : > { %1036 = vmatmul.mubr.msk.bf16.gmra.mrb[28].mxu0 %vm295_vm1, %v289_v13 }
 0x159   : > { %v1466_v14 = vpop.f32.mrb[0].mxu0 }
 0x15a   : > { %v1468_v15 = vpop.f32.mrb[1].mxu0 }
 0x15b   : > { %v1470_v16 = vpop.f32.mrb[2].mxu0  ;;  %v440_v17 = vmax.f32 %v1466_v14, %v1468_v15 }
 0x15c   : > { %v1474_v18 = vpop.f32.mrb[3].mxu0 }
 0x15d   : > { %441 = vmax.xlane.f32.xlu0 %v440_v17  ;;  %v443_v19 = vmax.f32 %v1470_v16, %v1474_v18 }
 0x15f   : > { %444 = vmax.xlane.f32.xlu1 %v443_v19 }
 0x161   : > { %v1478_v20 = vpop.f32.mrb[4].mxu0 }
 0x162   : > { %v1480_v21 = vpop.f32.mrb[5].mxu0 }
 0x163   : > { %v1482_v22 = vpop.f32.mrb[6].mxu0  ;;  %v446_v23 = vmax.f32 %v1478_v20, %v1480_v21 }
 0x164   : > { %v1486_v24 = vpop.f32.mrb[7].mxu0 }
 0x165   : > { %447 = vmax.xlane.f32.xlu1 %v446_v23  ;;  %v449_v25 = vmax.f32 %v1482_v22, %v1486_v24 }
 0x169   : > { %450 = vmax.xlane.f32.xlu1 %v449_v25  ;;  %v1490_v26 = vpop.f32.mrb[8].mxu0 }
 0x16a   : > { %v1492_v27 = vpop.f32.mrb[9].mxu0 }
 0x16b   : > { %v1494_v28 = vpop.f32.mrb[10].mxu0  ;;  %v452_v29 = vmax.f32 %v1490_v26, %v1492_v27 }
 0x16c   : > { %v1498_v30 = vpop.f32.mrb[11].mxu0 }
 0x16d   : > { %453 = vmax.xlane.f32.xlu1 %v452_v29  ;;  %v455_v31 = vmax.f32 %v1494_v28, %v1498_v30 }
 0x171   : > { %456 = vmax.xlane.f32.xlu1 %v455_v31  ;;  %v1502_v32 = vpop.f32.mrb[12].mxu0 }
 0x172   : > { %v1504_v33 = vpop.f32.mrb[13].mxu0 }
 0x173   : > { %v1506_v34 = vpop.f32.mrb[14].mxu0  ;;  %v458_v35 = vmax.f32 %v1502_v32, %v1504_v33 }
 0x174   : > { %v1510_v36 = vpop.f32.mrb[15].mxu0 }
 0x175   : > { %459 = vmax.xlane.f32.xlu1 %v458_v35  ;;  %v461_v37 = vmax.f32 %v1506_v34, %v1510_v36 }
 0x179   : > { %462 = vmax.xlane.f32.xlu1 %v461_v37  ;;  %v1514_v38 = vpop.f32.mrb[16].mxu0 }
 0x17a   : > { %v1516_v39 = vpop.f32.mrb[17].mxu0 }
 0x17b   : > { %v1518_v40 = vpop.f32.mrb[18].mxu0  ;;  %v464_v41 = vmax.f32 %v1514_v38, %v1516_v39 }
 0x17c   : > { %v1522_v42 = vpop.f32.mrb[19].mxu0 }
 0x17d   : > { %465 = vmax.xlane.f32.xlu1 %v464_v41  ;;  %v467_v43 = vmax.f32 %v1518_v40, %v1522_v42 }
 0x181   : > { %468 = vmax.xlane.f32.xlu1 %v467_v43  ;;  %v1526_v44 = vpop.f32.mrb[20].mxu0 }
 0x182   : > { %v1528_v45 = vpop.f32.mrb[21].mxu0 }
 0x183   : > { %v1530_v46 = vpop.f32.mrb[22].mxu0  ;;  %v470_v47 = vmax.f32 %v1526_v44, %v1528_v45 }
 0x184   : > { %v1534_v48 = vpop.f32.mrb[23].mxu0 }
 0x185   : > { %471 = vmax.xlane.f32.xlu1 %v470_v47  ;;  %v473_v49 = vmax.f32 %v1530_v46, %v1534_v48 }
 0x189   : > { %474 = vmax.xlane.f32.xlu1 %v473_v49  ;;  %v1538_v50 = vpop.f32.mrb[24].mxu0 }
 0x18a   : > { %v1540_v51 = vpop.f32.mrb[25].mxu0 }
 0x18b   : > { %v1542_v52 = vpop.f32.mrb[26].mxu0  ;;  %v476_v53 = vmax.f32 %v1538_v50, %v1540_v51 }
 0x18c   : > { %v1546_v54 = vpop.f32.mrb[27].mxu0 }
 0x18d   : > { %477 = vmax.xlane.f32.xlu1 %v476_v53  ;;  %v479_v55 = vmax.f32 %v1542_v52, %v1546_v54 }
 0x18f   : > { %480 = vmax.xlane.f32.xlu0 %v479_v55 }
 0x191   : > { %v1550_v56 = vpop.f32.mrb[28].mxu0 }
 0x192   : > { %v1552_v57 = vpop.f32.mrb[29].mxu0 }
 0x193   : > { %v1554_v58 = vpop.f32.mrb[30].mxu0  ;;  %v482_v59 = vmax.f32 %v1550_v56, %v1552_v57 }
 0x194   : > { %v1558_v60 = vpop.f32.mrb[31].mxu0 }
 0x195   : > { %483 = vmax.xlane.f32.xlu1 %v482_v59  ;;  %v485_v61 = vmax.f32 %v1554_v58, %v1558_v60 }
 0x197   : > { %486 = vmax.xlane.f32.xlu0 %v485_v61 }
 0x1ea   : > { %v442_v62 = vpop.xlane.xlu0 %441 }
 0x1eb   : > { %v488_v63 = vsub.f32 %v1466_v14, %v442_v62  ;;  %v489_v0 = vsub.f32 %v1468_v15, %v442_v62 }
 0x1ec   : > { %v445_v1 = vpop.xlane.xlu1 %444 }
 0x1ed   : > { %v520_v2 = vmul.f32 1.442695, %v488_v63  ;;  %v522_v3 = vmul.f32 1.442695, %v489_v0  ;;  %v490_v4 = vsub.f32 %v1470_v16, %v445_v1  ;;  %v491_v5 = vsub.f32 %v1474_v18, %v445_v1 }
 0x1ef   : > { %1152 = vpow2.f32 %v520_v2  ;;  %v524_v6 = vmul.f32 1.442695, %v490_v4  ;;  %v526_v7 = vmul.f32 1.442695, %v491_v5 }
 0x1f0   : > { %1154 = vpow2.f32 %v522_v3 }
 0x1f1   : > { %1156 = vpow2.f32 %v524_v6 }
 0x1f2   : > { %1158 = vpow2.f32 %v526_v7  ;;  %v448_v8 = vpop.xlane.xlu1 %447 }
 0x1f3   : > { %v492_v9 = vsub.f32 %v1478_v20, %v448_v8  ;;  %v493_v10 = vsub.f32 %v1480_v21, %v448_v8 }
 0x1f5   : > { %v528_v11 = vmul.f32 1.442695, %v492_v9  ;;  %v530_v12 = vmul.f32 1.442695, %v493_v10 }
 0x1f6   : > { %v451_v13 = vpop.xlane.xlu1 %450 }
 0x1f7   : > { %1160 = vpow2.f32 %v528_v11  ;;  %v494_v14 = vsub.f32 %v1482_v22, %v451_v13  ;;  %v495_v15 = vsub.f32 %v1486_v24, %v451_v13 }
 0x1f8   : > { %1162 = vpow2.f32 %v530_v12 }
 0x1f9   : > { %v1570_v16 = vpop.eup %1152  ;;  %v532_v17 = vmul.f32 1.442695, %v494_v14  ;;  %v534_v18 = vmul.f32 1.442695, %v495_v15 }
 0x1fa   : > { %v1572_v19 = vpop.eup %1154  ;;  %v454_v23 = vpop.xlane.xlu1 %453 }
 0x1fb   : > { %v1574_v25 = vpop.eup %1156  ;;  %1164 = vpow2.f32 %v532_v17  ;;  %v496_v20 = vsub.f32 %v1490_v26, %v454_v23  ;;  %v497_v21 = vsub.f32 %v1492_v27, %v454_v23  ;;  %v584_v22 = vadd.f32 %v1572_v19, %v1570_v16 }
 0x1fc   : > { %v1580_v29 = vpop.eup %1158  ;;  %1166 = vpow2.f32 %v534_v18 }
 0x1fd   : > { %v536_v24 = vmul.f32 1.442695, %v496_v20  ;;  %v538_v31 = vmul.f32 1.442695, %v497_v21  ;;  %585 = vadd.xlane.f32.xlu1 %v584_v22  ;;  %v587_v35 = vadd.f32 %v1580_v29, %v1574_v25 }
 0x1fe   : > { %v457_v37 = vpop.xlane.xlu1 %456 }
 0x1ff   : > { %1168 = vpow2.f32 %v536_v24  ;;  %v498_v41 = vsub.f32 %v1494_v28, %v457_v37  ;;  %v499_v26 = vsub.f32 %v1498_v30, %v457_v37  ;;  %588 = vadd.xlane.f32.xlu0 %v587_v35 }
 0x200   : > { %1170 = vpow2.f32 %v538_v31 }
 0x201   : > { %v1586_v27 = vpop.eup %1160  ;;  %v540_v43 = vmul.f32 1.442695, %v498_v41  ;;  %v542_v47 = vmul.f32 1.442695, %v499_v26 }
 0x202   : > { %v1588_v49 = vpop.eup %1162  ;;  %v460_v53 = vpop.xlane.xlu1 %459 }
 0x203   : > { %1172 = vpow2.f32 %v540_v43  ;;  %v500_v55 = vsub.f32 %v1502_v32, %v460_v53  ;;  %v501_v59 = vsub.f32 %v1504_v33, %v460_v53  ;;  %v590_v61 = vadd.f32 %v1588_v49, %v1586_v27 }
 0x204   : > { %1174 = vpow2.f32 %v542_v47 }
 0x205   : > { %v1594_v28 = vpop.eup %1164  ;;  %v544_v30 = vmul.f32 1.442695, %v500_v55  ;;  %v546_v62 = vmul.f32 1.442695, %v501_v59  ;;  %591 = vadd.xlane.f32.xlu1 %v590_v61 }
 0x206   : > { %v1596_v63 = vpop.eup %1166  ;;  %v463_v0 = vpop.xlane.xlu1 %462 }
 0x207   : > { %1176 = vpow2.f32 %v544_v30  ;;  %v502_v1 = vsub.f32 %v1506_v34, %v463_v0  ;;  %v503_v2 = vsub.f32 %v1510_v36, %v463_v0  ;;  %v593_v32 = vadd.f32 %v1596_v63, %v1594_v28 }
 0x208   : > { %1178 = vpow2.f32 %v546_v62 }
 0x209   : > { %v1602_v33 = vpop.eup %1168  ;;  %v548_v3 = vmul.f32 1.442695, %v502_v1  ;;  %v550_v4 = vmul.f32 1.442695, %v503_v2  ;;  %594 = vadd.xlane.f32.xlu0 %v593_v32 }
 0x20a   : > { %v1604_v5 = vpop.eup %1170  ;;  %v466_v6 = vpop.xlane.xlu1 %465 }
 0x20b   : > { %1180 = vpow2.f32 %v548_v3  ;;  %v504_v7 = vsub.f32 %v1514_v38, %v466_v6  ;;  %v505_v8 = vsub.f32 %v1516_v39, %v466_v6  ;;  %v596_v34 = vadd.f32 %v1604_v5, %v1602_v33 }
 0x20c   : > { %1182 = vpow2.f32 %v550_v4 }
 0x20d   : > { %v1610_v36 = vpop.eup %1172  ;;  %v552_v9 = vmul.f32 1.442695, %v504_v7  ;;  %v554_v10 = vmul.f32 1.442695, %v505_v8  ;;  %597 = vadd.xlane.f32.xlu1 %v596_v34 }
 0x20e   : > { %v1612_v11 = vpop.eup %1174  ;;  %v469_v12 = vpop.xlane.xlu1 %468 }
 0x20f   : > { %1184 = vpow2.f32 %v552_v9  ;;  %v506_v13 = vsub.f32 %v1518_v40, %v469_v12  ;;  %v507_v14 = vsub.f32 %v1522_v42, %v469_v12  ;;  %v599_v38 = vadd.f32 %v1612_v11, %v1610_v36 }
 0x210   : > { %1186 = vpow2.f32 %v554_v10 }
 0x211   : > { %v1618_v39 = vpop.eup %1176  ;;  %v556_v15 = vmul.f32 1.442695, %v506_v13  ;;  %v558_v17 = vmul.f32 1.442695, %v507_v14  ;;  %600 = vadd.xlane.f32.xlu0 %v599_v38 }
 0x212   : > { %v1620_v18 = vpop.eup %1178  ;;  %v472_v23 = vpop.xlane.xlu1 %471 }
 0x213   : > { %1188 = vpow2.f32 %v556_v15  ;;  %v508_v20 = vsub.f32 %v1526_v44, %v472_v23  ;;  %v509_v21 = vsub.f32 %v1528_v45, %v472_v23  ;;  %v602_v40 = vadd.f32 %v1620_v18, %v1618_v39 }
 0x214   : > { %1190 = vpow2.f32 %v558_v17 }
 0x215   : > { %v1626_v42 = vpop.eup %1180  ;;  %v560_v22 = vmul.f32 1.442695, %v508_v20  ;;  %v562_v24 = vmul.f32 1.442695, %v509_v21  ;;  %603 = vadd.xlane.f32.xlu1 %v602_v40 }
 0x216   : > { %v1628_v31 = vpop.eup %1182  ;;  %v475_v35 = vpop.xlane.xlu1 %474 }
 0x217   : > { %1192 = vpow2.f32 %v560_v22  ;;  %v510_v37 = vsub.f32 %v1530_v46, %v475_v35  ;;  %v511_v41 = vsub.f32 %v1534_v48, %v475_v35  ;;  %v605_v44 = vadd.f32 %v1628_v31, %v1626_v42 }
 0x218   : > { %1194 = vpow2.f32 %v562_v24 }
 0x219   : > { %v1634_v45 = vpop.eup %1184  ;;  %v564_v26 = vmul.f32 1.442695, %v510_v37  ;;  %v566_v43 = vmul.f32 1.442695, %v511_v41  ;;  %606 = vadd.xlane.f32.xlu0 %v605_v44  ;;  %v1148_v41 = vld [vmem:[%s1694_s11 + $0x4] ss:$8 sps:$4 sm:$0xff]  }
 0x21a   : > { %v1636_v47 = vpop.eup %1186  ;;  %v478_v53 = vpop.xlane.xlu1 %477  ;;  %v1151_v44 = vld [vmem:[%s1694_s11 + $0x14] ss:$8 sps:$4 sm:$0xff]   ;;  %784 = vmatprep.mubr.bf16.mxu0 %v1148_v41 }
 0x21b   : > { %1196 = vpow2.f32 %v564_v26  ;;  %v512_v55 = vsub.f32 %v1538_v50, %v478_v53  ;;  %v513_v59 = vsub.f32 %v1540_v51, %v478_v53  ;;  %v608_v46 = vadd.f32 %v1636_v47, %v1634_v45  ;;  %792 = vmatprep.mubr.bf16.mxu1 %v1151_v44 }
 0x21c   : > { %1198 = vpow2.f32 %v566_v43  ;;  %v481_v48 = vpop.xlane.xlu0 %480 }
 0x21d   : > { %v1642_v61 = vpop.eup %1188  ;;  %v568_v30 = vmul.f32 1.442695, %v512_v55  ;;  %v570_v62 = vmul.f32 1.442695, %v513_v59  ;;  %609 = vadd.xlane.f32.xlu1 %v608_v46  ;;  %v514_v0 = vsub.f32 %v1542_v52, %v481_v48  ;;  %v515_v1 = vsub.f32 %v1546_v54, %v481_v48 }
 0x21e   : > { %v1646_v2 = vpop.eup %1190 }
 0x21f   : > { %1200 = vpow2.f32 %v568_v30  ;;  %v572_v50 = vmul.f32 1.442695, %v514_v0  ;;  %v574_v32 = vmul.f32 1.442695, %v515_v1  ;;  %v611_v51 = vadd.f32 %v1646_v2, %v1642_v61 }
 0x220   : > { %1202 = vpow2.f32 %v570_v62 }
 0x221   : > { %v1650_v3 = vpop.eup %1192  ;;  %1204 = vpow2.f32 %v572_v50  ;;  %612 = vadd.xlane.f32.xlu0 %v611_v51 }
 0x222   : > { %v1652_v4 = vpop.eup %1194  ;;  %1206 = vpow2.f32 %v574_v32  ;;  %v484_v6 = vpop.xlane.xlu1 %483 }
 0x223   : > { %v516_v52 = vsub.f32 %v1550_v56, %v484_v6  ;;  %v517_v54 = vsub.f32 %v1552_v57, %v484_v6  ;;  %v614_v7 = vadd.f32 %v1652_v4, %v1650_v3 }
 0x224   : > { %v487_v8 = vpop.xlane.xlu0 %486 }
 0x225   : > { %v1658_v34 = vpop.eup %1196  ;;  %v576_v9 = vmul.f32 1.442695, %v516_v52  ;;  %v578_v10 = vmul.f32 1.442695, %v517_v54  ;;  %615 = vadd.xlane.f32.xlu1 %v614_v7  ;;  %v518_v12 = vsub.f32 %v1554_v58, %v487_v8  ;;  %v519_v13 = vsub.f32 %v1558_v60, %v487_v8 }
 0x226   : > { %v1662_v14 = vpop.eup %1198 }
 0x227   : > { %1208 = vpow2.f32 %v576_v9  ;;  %v580_v38 = vmul.f32 1.442695, %v518_v12  ;;  %v582_v56 = vmul.f32 1.442695, %v519_v13  ;;  %v617_v57 = vadd.f32 %v1662_v14, %v1658_v34 }
 0x228   : > { %1210 = vpow2.f32 %v578_v10 }
 0x229   : > { %v1666_v15 = vpop.eup %1200  ;;  %1212 = vpow2.f32 %v580_v38  ;;  %618 = vadd.xlane.f32.xlu0 %v617_v57 }
 0x22a   : > { %v1668_v17 = vpop.eup %1202  ;;  %1214 = vpow2.f32 %v582_v56 }
 0x22b   : > { %v1670_v58 = vpop.eup %1204  ;;  %v620_v60 = vadd.f32 %v1668_v17, %v1666_v15 }
 0x22c   : > { %v1674_v23 = vpop.eup %1206 }
 0x22d   : > { %621 = vadd.xlane.f32.xlu1 %v620_v60  ;;  %v623_v20 = vadd.f32 %v1674_v23, %v1670_v58 }
 0x22f   : > { %624 = vadd.xlane.f32.xlu0 %v623_v20 }
 0x231   : > { %v1678_v21 = vpop.eup %1208 }
 0x232   : > { %v1680_v40 = vpop.eup %1210 }
 0x233   : > { %v1682_v22 = vpop.eup %1212  ;;  %v626_v24 = vadd.f32 %v1680_v40, %v1678_v21 }
 0x234   : > { %v1686_v35 = vpop.eup %1214 }
 0x235   : > { %627 = vadd.xlane.f32.xlu1 %v626_v24  ;;  %v629_v37 = vadd.f32 %v1686_v35, %v1682_v22 }
 0x237   : > { %630 = vadd.xlane.f32.xlu0 %v629_v37 }
 0x28a   : > { %v586_v26 = vpop.xlane.xlu1 %585 }
 0x28b   : > { %1216 = vrcp.f32 %v586_v26 }
 0x28c   : > { %v589_v43 = vpop.xlane.xlu0 %588 }
 0x28d   : > { %1218 = vrcp.f32 %v589_v43 }
 0x292   : > { %v592_v53 = vpop.xlane.xlu1 %591 }
 0x293   : > { %1220 = vrcp.f32 %v592_v53 }
 0x295   : > { %v1217_v55 = vpop.eup %1216 }
 0x296   : > { %v595_v59 = vpop.xlane.xlu0 %594  ;;  %v649_v46 = vmul.f32 %v1217_v55, %v1572_v19  ;;  %v648_v48 = vmul.f32 %v1217_v55, %v1570_v16 }
 0x297   : > { %v1219_v30 = vpop.eup %1218  ;;  %1222 = vrcp.f32 %v595_v59 }
 0x298   : > { %v651_v62 = vmul.f32 %v1219_v30, %v1580_v29  ;;  %v650_v0 = vmul.f32 %v1219_v30, %v1574_v25  ;;  %680 = vst [vmem:[%s1706_s13] sm:$0xff] %v648_v48  ;;  %681 = vst [vmem:[%s1706_s13 + $0x8] sm:$0xff] %v649_v46 }
 0x29a   : > { %v598_v1 = vpop.xlane.xlu1 %597  ;;  %v717_v19 = vpack.c.bf16 %v651_v62, %v649_v46  ;;  %v716_v50 = vpack.c.bf16 %v650_v0, %v648_v48  ;;  %682 = vst [vmem:[%s1706_s13 + $0x10] sm:$0xff] %v650_v0  ;;  %683 = vst [vmem:[%s1706_s13 + $0x18] sm:$0xff] %v651_v62 }
 0x29b   : > { %1224 = vrcp.f32 %v598_v1 }
 0x29c   : > { %752 = vmatprep.subr.bf16.mxu0 %v717_v19  ;;  %1054 = vmatprep.subr.bf16.mxu1 %v717_v19 }
 0x29d   : > { %v1221_v16 = vpop.eup %1220  ;;  %753 = vmatpush1.bf16.xpose.msra.mxu0 %v716_v50  ;;  %1062 = vmatpush1.bf16.xpose.msra.mxu1 %v716_v50 }
 0x29e   : > { %v601_v25 = vpop.xlane.xlu0 %600  ;;  %v653_v29 = vmul.f32 %v1221_v16, %v1588_v49  ;;  %v652_v32 = vmul.f32 %v1221_v16, %v1586_v27 }
 0x29f   : > { %1226 = vrcp.f32 %v601_v25 }
 0x2a0   : > { %684 = vst [vmem:[%s1706_s13 + $0x20] sm:$0xff] %v652_v32  ;;  %685 = vst [vmem:[%s1706_s13 + $0x28] sm:$0xff] %v653_v29 }
 0x2a1   : > { %v1223_v51 = vpop.eup %1222 }
 0x2a2   : > { %v604_v6 = vpop.xlane.xlu1 %603  ;;  %v655_v52 = vmul.f32 %v1223_v51, %v1596_v63  ;;  %v654_v54 = vmul.f32 %v1223_v51, %v1594_v28 }
 0x2a3   : > { %1228 = vrcp.f32 %v604_v6 }
 0x2a4   : > { %v719_v7 = vpack.c.bf16 %v655_v52, %v653_v29  ;;  %v718_v8 = vpack.c.bf16 %v654_v54, %v652_v32  ;;  %686 = vst [vmem:[%s1706_s13 + $0x30] sm:$0xff] %v654_v54  ;;  %687 = vst [vmem:[%s1706_s13 + $0x38] sm:$0xff] %v655_v52  ;;  %v1149_v52 = vld [vmem:[%s1694_s11 + $0x10] ss:$8 sps:$4 sm:$0xff]  }
 0x2a5   : > { %v1225_v9 = vpop.eup %1224 }
 0x2a6   : > { %754 = vmatprep.subr.bf16.mxu0 %v719_v7  ;;  %1055 = vmatprep.subr.bf16.mxu1 %v719_v7  ;;  %v607_v27 = vpop.xlane.xlu0 %606  ;;  %v657_v49 = vmul.f32 %v1225_v9, %v1604_v5  ;;  %v656_v10 = vmul.f32 %v1225_v9, %v1602_v33 }
 0x2a7   : > { %1230 = vrcp.f32 %v607_v27  ;;  %755 = vmatpush1.bf16.xpose.msra.mxu0 %v718_v8  ;;  %1063 = vmatpush1.bf16.xpose.msra.mxu1 %v718_v8 }
 0x2a8   : > { %688 = vst [vmem:[%s1706_s13 + $0x40] sm:$0xff] %v656_v10  ;;  %689 = vst [vmem:[%s1706_s13 + $0x48] sm:$0xff] %v657_v49 }
 0x2a9   : > { %v1227_v28 = vpop.eup %1226 }
 0x2aa   : > { %v610_v63 = vpop.xlane.xlu1 %609  ;;  %v659_v12 = vmul.f32 %v1227_v28, %v1612_v11  ;;  %v658_v13 = vmul.f32 %v1227_v28, %v1610_v36 }
 0x2ab   : > { %1232 = vrcp.f32 %v610_v63 }
 0x2ac   : > { %v721_v38 = vpack.c.bf16 %v659_v12, %v657_v49  ;;  %v720_v56 = vpack.c.bf16 %v658_v13, %v656_v10  ;;  %690 = vst [vmem:[%s1706_s13 + $0x50] sm:$0xff] %v658_v13  ;;  %691 = vst [vmem:[%s1706_s13 + $0x58] sm:$0xff] %v659_v12 }
 0x2ad   : > { %v1229_v5 = vpop.eup %1228 }
 0x2ae   : > { %756 = vmatprep.subr.bf16.mxu0 %v721_v38  ;;  %1056 = vmatprep.subr.bf16.mxu1 %v721_v38  ;;  %v613_v33 = vpop.xlane.xlu0 %612  ;;  %v661_v57 = vmul.f32 %v1229_v5, %v1620_v18  ;;  %v660_v60 = vmul.f32 %v1229_v5, %v1618_v39 }
 0x2af   : > { %1234 = vrcp.f32 %v613_v33  ;;  %757 = vmatpush1.bf16.xpose.msra.mxu0 %v720_v56  ;;  %1064 = vmatpush1.bf16.xpose.msra.mxu1 %v720_v56 }
 0x2b0   : > { %692 = vst [vmem:[%s1706_s13 + $0x60] sm:$0xff] %v660_v60  ;;  %693 = vst [vmem:[%s1706_s13 + $0x68] sm:$0xff] %v661_v57 }
 0x2b1   : > { %v1231_v36 = vpop.eup %1230 }
 0x2b2   : > { %v616_v11 = vpop.xlane.xlu1 %615  ;;  %v663_v20 = vmul.f32 %v1231_v36, %v1628_v31  ;;  %v662_v24 = vmul.f32 %v1231_v36, %v1626_v42 }
 0x2b3   : > { %1236 = vrcp.f32 %v616_v11 }
 0x2b4   : > { %v723_v37 = vpack.c.bf16 %v663_v20, %v661_v57  ;;  %v722_v41 = vpack.c.bf16 %v662_v24, %v660_v60  ;;  %694 = vst [vmem:[%s1706_s13 + $0x70] sm:$0xff] %v662_v24  ;;  %695 = vst [vmem:[%s1706_s13 + $0x78] sm:$0xff] %v663_v20 }
 0x2b5   : > { %v1233_v18 = vpop.eup %1232 }
 0x2b6   : > { %758 = vmatprep.subr.bf16.mxu0 %v723_v37  ;;  %1057 = vmatprep.subr.bf16.mxu1 %v723_v37  ;;  %v619_v39 = vpop.xlane.xlu0 %618  ;;  %v665_v44 = vmul.f32 %v1233_v18, %v1636_v47  ;;  %v664_v26 = vmul.f32 %v1233_v18, %v1634_v45 }
 0x2b7   : > { %1238 = vrcp.f32 %v619_v39  ;;  %759 = vmatpush1.bf16.xpose.msra.mxu0 %v722_v41  ;;  %1065 = vmatpush1.bf16.xpose.msra.mxu1 %v722_v41 }
 0x2b8   : > { %696 = vst [vmem:[%s1706_s13 + $0x80] sm:$0xff] %v664_v26  ;;  %697 = vst [vmem:[%s1706_s13 + $0x88] sm:$0xff] %v665_v44 }
 0x2b9   : > { %v1235_v42 = vpop.eup %1234 }
 0x2ba   : > { %v622_v31 = vpop.xlane.xlu1 %621  ;;  %v667_v43 = vmul.f32 %v1235_v42, %v1646_v2  ;;  %v666_v53 = vmul.f32 %v1235_v42, %v1642_v61 }
 0x2bb   : > { %1240 = vrcp.f32 %v622_v31 }
 0x2bc   : > { %v625_v55 = vpop.xlane.xlu0 %624  ;;  %v725_v59 = vpack.c.bf16 %v667_v43, %v665_v44  ;;  %v724_v47 = vpack.c.bf16 %v666_v53, %v664_v26  ;;  %698 = vst [vmem:[%s1706_s13 + $0x90] sm:$0xff] %v666_v53  ;;  %699 = vst [vmem:[%s1706_s13 + $0x98] sm:$0xff] %v667_v43 }
 0x2bd   : > { %v1237_v45 = vpop.eup %1236  ;;  %1242 = vrcp.f32 %v625_v55 }
 0x2be   : > { %760 = vmatprep.subr.bf16.mxu0 %v725_v59  ;;  %1058 = vmatprep.subr.bf16.mxu1 %v725_v59  ;;  %v669_v46 = vmul.f32 %v1237_v45, %v1652_v4  ;;  %v668_v2 = vmul.f32 %v1237_v45, %v1650_v3 }
 0x2bf   : > { %761 = vmatpush1.bf16.xpose.msra.mxu0 %v724_v47  ;;  %1066 = vmatpush1.bf16.xpose.msra.mxu1 %v724_v47 }
 0x2c0   : > { %700 = vst [vmem:[%s1706_s13 + $0xa0] sm:$0xff] %v668_v2  ;;  %701 = vst [vmem:[%s1706_s13 + $0xa8] sm:$0xff] %v669_v46 }
 0x2c1   : > { %v1239_v61 = vpop.eup %1238 }
 0x2c2   : > { %v628_v48 = vpop.xlane.xlu1 %627  ;;  %v671_v30 = vmul.f32 %v1239_v61, %v1662_v14  ;;  %v670_v62 = vmul.f32 %v1239_v61, %v1658_v34 }
 0x2c3   : > { %1244 = vrcp.f32 %v628_v48 }
 0x2c4   : > { %v631_v0 = vpop.xlane.xlu0 %630  ;;  %v727_v1 = vpack.c.bf16 %v671_v30, %v669_v46  ;;  %v726_v19 = vpack.c.bf16 %v670_v62, %v668_v2  ;;  %702 = vst [vmem:[%s1706_s13 + $0xb0] sm:$0xff] %v670_v62  ;;  %703 = vst [vmem:[%s1706_s13 + $0xb8] sm:$0xff] %v671_v30 }
 0x2c5   : > { %v1241_v3 = vpop.eup %1240  ;;  %1246 = vrcp.f32 %v631_v0 }
 0x2c6   : > { %762 = vmatprep.subr.bf16.mxu0 %v727_v1  ;;  %1059 = vmatprep.subr.bf16.mxu1 %v727_v1  ;;  %v673_v4 = vmul.f32 %v1241_v3, %v1668_v17  ;;  %v672_v14 = vmul.f32 %v1241_v3, %v1666_v15 }
 0x2c7   : > { %v1243_v50 = vpop.eup %1242  ;;  %763 = vmatpush1.bf16.xpose.msra.mxu0 %v726_v19  ;;  %1067 = vmatpush1.bf16.xpose.msra.mxu1 %v726_v19 }
 0x2c8   : > { %v675_v34 = vmul.f32 %v1243_v50, %v1674_v23  ;;  %v674_v16 = vmul.f32 %v1243_v50, %v1670_v58  ;;  %704 = vst [vmem:[%s1706_s13 + $0xc0] sm:$0xff] %v672_v14  ;;  %705 = vst [vmem:[%s1706_s13 + $0xc8] sm:$0xff] %v673_v4 }
 0x2ca   : > { %v729_v25 = vpack.c.bf16 %v675_v34, %v673_v4  ;;  %706 = vst [vmem:[%s1706_s13 + $0xd0] sm:$0xff] %v674_v16  ;;  %707 = vst [vmem:[%s1706_s13 + $0xd8] sm:$0xff] %v675_v34  ;;  %v728_v15 = vpack.c.bf16 %v674_v16, %v672_v14 }
 0x2cc   : > { %764 = vmatprep.subr.bf16.mxu0 %v729_v25  ;;  %1060 = vmatprep.subr.bf16.mxu1 %v729_v25 }
 0x2cd   : > { %v1245_v17 = vpop.eup %1244 }
 0x2ce   : > { %v677_v29 = vmul.f32 %v1245_v17, %v1680_v40  ;;  %v676_v32 = vmul.f32 %v1245_v17, %v1678_v21  ;;  %v1146_v21 = vld [vmem:[%s1694_s11] ss:$8 sps:$4 sm:$0xff]  }
 0x2cf   : > { %v1247_v23 = vpop.eup %1246  ;;  %765 = vmatpush1.bf16.xpose.msra.mxu0 %v728_v15  ;;  %1068 = vmatpush1.bf16.xpose.msra.mxu1 %v728_v15 }
 0x2d0   : > { %v679_v58 = vmul.f32 %v1247_v23, %v1686_v35  ;;  %v678_v51 = vmul.f32 %v1247_v23, %v1682_v22  ;;  %708 = vst [vmem:[%s1706_s13 + $0xe0] sm:$0xff] %v676_v32  ;;  %709 = vst [vmem:[%s1706_s13 + $0xe8] sm:$0xff] %v677_v29 }
 0x2d2   : > { %v731_v6 = vpack.c.bf16 %v679_v58, %v677_v29  ;;  %710 = vst [vmem:[%s1706_s13 + $0xf0] sm:$0xff] %v678_v51  ;;  %711 = vst [vmem:[%s1706_s13 + $0xf8] sm:$0xff] %v679_v58  ;;  %v730_v40 = vpack.c.bf16 %v678_v51, %v676_v32 }
 0x2d4   : > { %766 = vmatprep.subr.bf16.mxu0 %v731_v6  ;;  %1061 = vmatprep.subr.bf16.mxu1 %v731_v6 }
 0x2d7   : > { %767 = vmatpush1.bf16.xpose.msra.mxu0 %v730_v40  ;;  %1069 = vmatpush1.bf16.xpose.msra.mxu1 %v730_v40 }
 0x2de   : > { %785 = vmatmul.mubr.bf16.vlgmr.msra.gmra.mrb[32].mxu0 %v1146_v21  ;;  %793 = vmatmul.mubr.bf16.vlgmr.msra.gmra.mrb[0].mxu1 %v1149_v52 }
 0x3ae   : > { %816 = sbr.rel (!%p1424_p3) target bundleno = 957 (0x3bd), region = 36 }
 0x3b1   : > { %v786_v35 = vpop.f32.mrb[32].mxu0  ;;  %v794_v54 = vpop.f32.mrb[0].mxu1 }
 0x3b2   : > { %801 = vst [vmem:[%s244_s23] sm:$0xff] %v786_v35  ;;  %803 = vst [vmem:[%s244_s23 + $0x10] sm:$0xff] %v794_v54  ;;  %v788_v22 = vpop.f32.mrb[33].mxu0  ;;  %v796_v7 = vpop.f32.mrb[1].mxu1 }
 0x3b3   : > { %v789_v8 = vpop.f32.mrb[34].mxu0  ;;  %v797_v9 = vpop.f32.mrb[2].mxu1 }
 0x3b4   : > { %802 = vst [vmem:[%s244_s23 + $0x8] sm:$0xff] %v789_v8  ;;  %804 = vst [vmem:[%s244_s23 + $0x18] sm:$0xff] %v797_v9  ;;  %v791_v27 = vpop.f32.mrb[35].mxu0  ;;  %v799_v49 = vpop.f32.mrb[3].mxu1 }
 0x3b9   : > { %v854_v10 = vld [vmem:[%s244_s23] sm:$0xff]  ;;  %v858_v63 = vld [vmem:[%s244_s23 + $0x10] sm:$0xff] }
 0x3ba   : > { %855 = vst [vmem:[%s820_s10] sm:$0xff] %v854_v10  ;;  %859 = vst [vmem:[%s820_s10 + $0x20] sm:$0xff] %v858_v63 }
 0x3bb   : > { %v856_v28 = vld [vmem:[%s244_s23 + $0x8] sm:$0xff]  ;;  %v860_v12 = vld [vmem:[%s244_s23 + $0x18] sm:$0xff] }
 0x3bc   : > { %857 = vst [vmem:[%s820_s10 + $0x10] sm:$0xff] %v856_v28  ;;  %861 = vst [vmem:[%s820_s10 + $0x30] sm:$0xff] %v860_v12 }
 0x3bd PF: > { %s1053_s11 = sshll.u32 %s1326_s18, 5  ;;  %s1047_s8 = sshll.u32 %s1330_s19, 6 }
 0x3be   : > { %s874_s14 = sadd.s32 %s1053_s11, %s1047_s8  ;;  %s877_s27 = sshll.u32 %s1706_s13, 4  ;;  %s1782_s27 = int_to_ptr.vmem [resolvable:$true] %s877_s27 }
 0x3bf   : > { %s1048_s24 = sshll.u32 %s874_s14, 7  ;;  %s1248_s6 = scalar_lea.vmem %s1782_s27, 4096 }
 0x3c0   : > { %s1787_s5 = scalar_lea.hbm %s1844_s4, %s1048_s24  ;;  %p1249_p0 = scmp.ne.s32.totalorder %s1782_s27, %s1248_s6 }
 0x3c1   : > { %s1345_s18 = smov [#allocation3]  }
 0x3c2   : > { %p1250_p1 = pnand %p1249_p0, %p1424_p3  ;;  %s1252_s19 = sshll.u32 %s1345_s18, 4  ;;  %s1253_s19 = int_to_ptr.vmem [resolvable:$false] %s1252_s19 }
 0x3c3   : > { %s1254_s13 = scalar_lea.vmem %s1253_s19, 8192  ;;  %p1255_p4 = scmp.lt.s32.totalorder %s1782_s27, %s1253_s19 }
 0x3c4   : > { %p1251_p2 = pneg %p1250_p1  ;;  %p1256_p5 = scmp.lt.s32.totalorder %s1254_s13, %s1248_s6 }
 0x3c6   : > { %p1257_p6 = por %p1256_p5, %p1255_p4 }
 0x3c8   : > { %p1258_p7 = pnand %p1257_p6, %p1251_p2 }
 0x3ca   : > { %1261 = shalt.err (!%p1258_p7)
}
 0x3cb   : > { %s1262_s24 = scalar_lea.hbm %s1787_s5, 4096  ;;  %s1266_s11 = scalar_lea.hbm %s1844_s4, 16384 }
 0x3cc   : > { %p1263_p9 = scmp.ne.s32.totalorder %s1787_s5, %s1262_s24  ;;  %p1267_p12 = scmp.lt.u32.totalorder %s1787_s5, %s1844_s4 }
 0x3cd   : > { %p1268_p13 = scmp.lt.u32.totalorder %s1266_s11, %s1262_s24  ;;  %p1270_p1 = scmp.lt.u32.totalorder %s1262_s24, %s1787_s5 }
 0x3ce   : > { %p1264_p10 = pnand %p1263_p9, %p1424_p3 }
 0x3cf   : > { %p1269_p0 = por %p1268_p13, %p1267_p12 }
 0x3d0   : > { %p1265_p11 = pneg %p1264_p10 }
 0x3d1   : > { %p1271_p2 = por %p1270_p1, %p1269_p0 }
 0x3d3   : > { %p1272_p4 = pnand %p1271_p2, %p1265_p11 }
 0x3d5   : > { %1275 = shalt.err (!%p1272_p4)
}
 0x3d6   : > { %s1346_s23 = smov 256   ;;  %s1347_s30 = smov 16  }
 0x3d7   : > { %s1847_s6 = scalar_lea.sflag [#allocation4], %s1699_s12 }
 0x3d8   : > { %1070 = dma.vmem_to_hbm [thread:$0]  (%p1424_p3), %s1782_s27, 4096, %s1787_s5, %s1847_s6, %s1346_s23, %s1346_s23, %s1347_s30  }
 0x3d9 PF: > { %p1076_p5 = scmp.ge.s32.totalorder %s1342_s22, 2  ;;  %s899_s18 = sand.u32 1, %s1314_s15  }
 0x3da   : > { %s900_s19 = scalar_lea.sflag [#allocation4], %s899_s18 }
 0x3db   : > { %p1073_p6 = pnand %p1076_p5, %p1433_p8 }
 0x3dd   : > { %1309 = dma.done.wait (!%p1073_p6), %s900_s19, 4096  }
 0x3de   : > { %1311 = vsyncadd (!%p1073_p6), %s900_s19, 4294963200  ;;  %s18_s22 = sadd.s32 1, %s1342_s22   ;;  %s1848_s15 = smov %s1318_s16 }
 0x3df   : > { %p15_p7 = scmp.ge.s32.totalorder %s18_s22, 6   ;;  %s1849_s16 = smov %s1322_s17 }
 0x3e0   : > { %s1850_s17 = smov %s1442_s7  ;;  %s1851_s18 = smov %s1334_s20 }
 0x3e1   : > { %s1852_s19 = smov %s1338_s21  ;;  %s1853_s20 = smov %s1856_s25 }
 0x3e2   : > { %s1854_s21 = smov %s1860_s26  ;;  %17 = sbr.rel (!%p15_p7) target bundleno = 5 (0x5), region = 123 }
 0x3e9   :  { %905 = vsyncpa [#allocation4], 1 }
 0x3ea   :  { %907 = vsyncpa [#allocation4 + $0x1], 1 }

</bundles_post_ra>
